<compile_context>
chip_gen: v7x
topology: tpu7x:2x2x1
jax: 0.10.0
libtpu: 0.0.40
codegen_flags: <defaults>
</compile_context>

<pallas_src>
import jax
import jax.numpy as jnp
from jax.experimental import pallas as pl
from jax.experimental.pallas import tpu as pltpu


def _round_up(x, m):
    return (x + m - 1) // m * m


def _vmem_limit(bytes_needed):
    """Generation-aware scoped-VMEM request (v7x: 64 MiB/TC, v5e/v6e: 128 MiB)."""
    try:
        cap = pltpu.get_tpu_info().vmem_capacity_bytes
    except Exception:
        cap = 64 << 20  # conservative fallback (valid on every generation)
    headroom = 8 << 20
    return int(min(max(bytes_needed + (2 << 20), 16 << 20), cap - headroom))


# ---------------------------------------------------------------------------
# Phase 1: W1 matmul + single-pass BatchNorm statistics (per row tile).
# ---------------------------------------------------------------------------
def _bn_stats_kernel(feats_ref, w1_ref, sum_ref, sumsq_ref):
    # Conv1d(dim_feat -> hidden, k=1) == matmul on the MXU.  feats arrive f32
    # and are cast to bf16 here (hides under the matmul; avoids a separate
    # wrapper-side cast pass over HBM).
    h = jnp.dot(feats_ref[...].astype(jnp.bfloat16), w1_ref[...],
                preferred_element_type=jnp.float32)              # (tn, H1) f32
    # Single-pass stats: sum and sum-of-squares only.  Zero-padded rows
    # contribute nothing; the wrapper divides by the real N.
    sum_ref[...] = jnp.sum(h, axis=0, keepdims=True)[None]       # (1, 1, H1)
    sumsq_ref[...] = jnp.sum(h * h, axis=0, keepdims=True)[None]


# ---------------------------------------------------------------------------
# Phase 2: BN (folded scale/shift) + ReLU + W2 + masked cross-entropy partials.
# ---------------------------------------------------------------------------
def _loss_kernel(feats_ref, w1_ref, scale_ref, shift_ref, w2_ref, b2_ref,
                 labels_ref, vis_ref, num_ref, den_ref):
    h = jnp.dot(feats_ref[...].astype(jnp.bfloat16), w1_ref[...],
                preferred_element_type=jnp.float32)              # (tn, H1) f32
    # BatchNorm folded to a single FMA (no `centered` intermediate); ReLU
    # output emitted directly in bf16 for the W2 MXU matmul.
    hr = jnp.maximum(h * scale_ref[...] + shift_ref[...], 0.0).astype(jnp.bfloat16)
    logits = jnp.dot(hr, w2_ref[...],
                     preferred_element_type=jnp.float32)         # (tn, L) f32
    logits = logits + b2_ref[...]

    # CrossEntropy(reduction='none'): lse(logits) - logits[row, label]
    m = jnp.max(logits, axis=-1, keepdims=True)
    lse = m + jnp.log(jnp.sum(jnp.exp(logits - m), axis=-1, keepdims=True))
    class_ids = jax.lax.broadcasted_iota(jnp.int32, logits.shape, 1)
    tgt = jnp.sum(jnp.where(class_ids == labels_ref[...], logits, 0.0),
                  axis=-1, keepdims=True)
    per_row = lse - tgt                                          # (tn, 1)

    # Visibility-masked partial sums for this tile.
    vis = vis_ref[...]
    num_ref[...] = jnp.sum(per_row * vis).reshape(1, 1, 1)
    den_ref[...] = jnp.sum(vis).reshape(1, 1, 1)


def landmark_consistency_loss(feats, w1, gamma, beta, w2, b2, labels, vis,
                              *, tile_n=256):
    """classifier (Conv1d + BN + ReLU + Conv1d) + visibility-masked CE mean.

    feats  : (N, C)  f32   N = batch * num_samples sampled landmark features
    w1     : (C, H1) f32   1x1 Conv1d(dim_feat -> hidden); its bias is omitted
                           (cancelled exactly by training-mode BatchNorm).
    gamma/beta : (1, H1) f32 BatchNorm affine.
    w2/b2  : (H1, L) / (1, L) f32   1x1 Conv1d(hidden -> num_landmarks).
    labels : (N, 1) int32,  vis : (N, 1) f32.
    """
    n_real, C = feats.shape
    H1 = w1.shape[1]
    L = w2.shape[1]

    # Row tiling: tile_n sized so per-tile f32/bf16 intermediates stay ~1-2 MiB
    # at real module shapes (H1=1024, L=1280); padded rows are zero (no effect
    # on BN statistics) with vis=0 (no effect on the masked CE mean).
    tile_n = min(tile_n, _round_up(n_real, 8))
    n_pad = _round_up(n_real, tile_n)
    num_tiles = n_pad // tile_n

    def pad_rows(a):
        extra = n_pad - a.shape[0]
        if extra == 0:
            return a
        return jnp.concatenate(
            [a, jnp.zeros((extra,) + a.shape[1:], a.dtype)], axis=0)

    feats_p = pad_rows(feats)
    labels_p = pad_rows(labels)
    vis_p = pad_rows(vis)

    # Weights cast to bf16 once (small, grid-invariant).
    w1_bf = w1.astype(jnp.bfloat16)
    w2_bf = w2.astype(jnp.bfloat16)

    # ------------------ phase 1: per-tile BN statistics -------------------
    p1_vmem = (2 * tile_n * C * 4          # feats tile, double-buffered
               + C * H1 * 2                # W1 (bf16, resident)
               + tile_n * H1 * 4           # h intermediate (f32)
               + 4 * H1 * 4)               # per-tile sum / sumsq blocks
    p1_cost = pl.CostEstimate(
        flops=2 * n_pad * C * H1 + 3 * n_pad * H1,
        transcendentals=0,
        bytes_accessed=n_pad * C * 4 + C * H1 * 2 + 2 * num_tiles * H1 * 4)
    sums, sumsqs = pl.pallas_call(
        _bn_stats_kernel,
        grid=(num_tiles,),
        in_specs=[pl.BlockSpec((tile_n, C), lambda i: (i, 0)),
                  pl.BlockSpec((C, H1), lambda i: (0, 0))],
        out_specs=[pl.BlockSpec((1, 1, H1), lambda i: (i, 0, 0)),
                   pl.BlockSpec((1, 1, H1), lambda i: (i, 0, 0))],
        out_shape=[jax.ShapeDtypeStruct((num_tiles, 1, H1), jnp.float32)] * 2,
        compiler_params=pltpu.CompilerParams(
            dimension_semantics=("parallel",),
            vmem_limit_bytes=_vmem_limit(p1_vmem)),
        cost_estimate=p1_cost,
    )(feats_p, w1_bf)

    # --- glue: fold BN (train-mode, biased var, eps=1e-5) into scale/shift ---
    inv_n = 1.0 / n_real
    mean = jnp.sum(sums.reshape(num_tiles, H1), axis=0) * inv_n
    var = jnp.sum(sumsqs.reshape(num_tiles, H1), axis=0) * inv_n - mean * mean
    var = jnp.maximum(var, 0.0)            # guard E[x^2] - mean^2 cancellation
    scale = gamma.reshape(H1) * jax.lax.rsqrt(var + 1e-5)
    shift = beta.reshape(H1) - mean * scale
    scale = scale.reshape(1, H1)
    shift = shift.reshape(1, H1)

    # --------------- phase 2: BN + ReLU + W2 + masked-CE ------------------
    lane = 128                              # (tile_n, 1) blocks pad to 128 lanes
    p2_vmem = (2 * (tile_n * C * 4 + 2 * tile_n * lane * 4)   # tiled inputs (x2)
               + C * H1 * 2 + H1 * L * 2                      # weights (bf16)
               + 2 * H1 * 4 + L * 4                           # scale/shift/b2
               + tile_n * H1 * 4                              # h (f32)
               + tile_n * H1 * 2                              # hr (bf16)
               + 2 * tile_n * L * 4)                          # logits + exp (f32)
    p2_cost = pl.CostEstimate(
        flops=(2 * n_pad * C * H1 + 2 * n_pad * H1 * L
               + 4 * n_pad * H1 + 8 * n_pad * L),
        transcendentals=n_pad * L + n_pad,
        bytes_accessed=(n_pad * C * 4 + C * H1 * 2 + H1 * L * 2
                        + 2 * H1 * 4 + L * 4 + 2 * n_pad * 4
                        + 2 * num_tiles * 4))
    num, den = pl.pallas_call(
        _loss_kernel,
        grid=(num_tiles,),
        in_specs=[pl.BlockSpec((tile_n, C), lambda i: (i, 0)),
                  pl.BlockSpec((C, H1), lambda i: (0, 0)),
                  pl.BlockSpec((1, H1), lambda i: (0, 0)),
                  pl.BlockSpec((1, H1), lambda i: (0, 0)),
                  pl.BlockSpec((H1, L), lambda i: (0, 0)),
                  pl.BlockSpec((1, L), lambda i: (0, 0)),
                  pl.BlockSpec((tile_n, 1), lambda i: (i, 0)),
                  pl.BlockSpec((tile_n, 1), lambda i: (i, 0))],
        out_specs=[pl.BlockSpec((1, 1, 1), lambda i: (i, 0, 0)),
                   pl.BlockSpec((1, 1, 1), lambda i: (i, 0, 0))],
        out_shape=[jax.ShapeDtypeStruct((num_tiles, 1, 1), jnp.float32)] * 2,
        compiler_params=pltpu.CompilerParams(
            dimension_semantics=("parallel",),
            vmem_limit_bytes=_vmem_limit(p2_vmem)),
        cost_estimate=p2_cost,
    )(feats_p, w1_bf, scale, shift, w2_bf, b2, labels_p, vis_p)

    # Guard the degenerate all-invisible batch (PyTorch would return NaN here).
    return jnp.sum(num) / jnp.maximum(jnp.sum(den), 1e-6)


# ---------------------------------------------------------------------------
# JAX glue: bilinear grid_sample (zeros padding, align_corners=False), NHWC.
# ---------------------------------------------------------------------------
def grid_sample_bilinear_zeros_nhwc(img_nhwc, grid):
    """F.grid_sample(img, grid[:, None], 'bilinear', 'zeros', align_corners=False).

    img_nhwc : (B, H, W, C) channel-last -- each tap is a C-contiguous gather.
    grid     : (B, S, 2) with (x, y) in [-1, 1]
    returns  : (B, S, C)
    """
    B, H, W, C = img_nhwc.shape
    x = ((grid[..., 0] + 1.0) * W - 1.0) * 0.5
    y = ((grid[..., 1] + 1.0) * H - 1.0) * 0.5
    x0 = jnp.floor(x)
    y0 = jnp.floor(y)
    x1 = x0 + 1.0
    y1 = y0 + 1.0
    wx1 = x - x0
    wx0 = 1.0 - wx1
    wy1 = y - y0
    wy0 = 1.0 - wy1

    def gather(iy, ix):
        valid = ((ix >= 0) & (ix <= W - 1) & (iy >= 0) & (iy <= H - 1)
                 ).astype(img_nhwc.dtype)
        ixc = jnp.clip(ix, 0, W - 1).astype(jnp.int32)
        iyc = jnp.clip(iy, 0, H - 1).astype(jnp.int32)
        v = jax.vmap(lambda im, yy, xx: im[yy, xx, :])(img_nhwc, iyc, ixc)
        return v * valid[..., None]                               # (B, S, C)

    return (gather(y0, x0) * (wy0 * wx0)[..., None]
            + gather(y0, x1) * (wy0 * wx1)[..., None]
            + gather(y1, x0) * (wy1 * wx0)[..., None]
            + gather(y1, x1) * (wy1 * wx1)[..., None])


def reference_loss(feats, w1, b1, gamma, beta, w2, b2, labels, vis):
    """Pure-JAX f32 reference (classifier incl. the pre-BN bias + CE + masked mean)."""
    h = feats @ w1 + b1
    mean = h.mean(axis=0, keepdims=True)
    var = ((h - mean) ** 2).mean(axis=0, keepdims=True)
    hn = (h - mean) / jnp.sqrt(var + 1e-5) * gamma + beta
    hr = jnp.maximum(hn, 0.0)
    logits = hr @ w2 + b2
    lse = jax.scipy.special.logsumexp(logits, axis=-1)
    tgt = jnp.take_along_axis(logits, labels, axis=-1)[:, 0]
    per_row = lse - tgt
    v = vis[:, 0]
    return jnp.sum(per_row * v) / jnp.sum(v)


if __name__ == "__main__":
    # small shapes consistent with the module (defaults 1280/256/64/1024 scaled down)
    B, C, H, W = 2, 64, 16, 16
    NUM_LANDMARKS, NUM_SAMPLES, HIDDEN = 256, 32, 128

    key = jax.random.PRNGKey(0)
    k = jax.random.split(key, 8)

    # module inputs (img_feat constructed in PyTorch NCHW layout)
    img_feat = jax.random.normal(k[0], (B, C, H, W), jnp.float32)
    landmark_2d = jax.random.uniform(k[1], (B, NUM_LANDMARKS, 2),
                                     jnp.float32, minval=-1.0, maxval=1.0)
    visiable = (jax.random.uniform(k[2], (B, NUM_LANDMARKS)) < 0.8).astype(jnp.float32)

    # deterministic parameter init (stand-in for weights_init / weights_init_classifier)
    w1 = jax.random.normal(k[3], (C, HIDDEN), jnp.float32) * 0.05
    b1 = jax.random.normal(k[6], (1, HIDDEN), jnp.float32) * 0.1   # cancelled by BN
    gamma = 1.0 + 0.02 * jax.random.normal(k[7], (1, HIDDEN), jnp.float32)
    beta = jnp.zeros((1, HIDDEN), jnp.float32)
    w2 = jax.random.normal(k[4], (HIDDEN, NUM_LANDMARKS), jnp.float32) * 0.05
    b2 = jnp.zeros((1, NUM_LANDMARKS), jnp.float32)

    # torch.randperm(num_landmarks)[:num_samples] -> fixed-key permutation
    select_index = jax.random.permutation(k[5], NUM_LANDMARKS)[:NUM_SAMPLES]

    # ---- glue: subset the landmarks FIRST, then bilinear-sample (NHWC) ----
    # TODO(synk): fully fusing the bilinear gather into phase 1 (scalar-prefetched
    # corner indices + manual make_async_copy of C-contiguous NHWC rows) would
    # remove the (B,S,C) feats HBM roundtrip entirely; left in JAX for now.
    img_nhwc = jnp.transpose(img_feat, (0, 2, 3, 1))              # (B, H, W, C)
    lm_sel = landmark_2d[:, select_index, :]                      # (B, S, 2)
    vis_sel = visiable[:, select_index]                           # (B, S)
    sampled = grid_sample_bilinear_zeros_nhwc(img_nhwc, lm_sel)   # (B, S, C)
    feats = sampled.reshape(B * NUM_SAMPLES, C)                   # (N, C) f32
    labels = jnp.tile(select_index.astype(jnp.int32), (B,)).reshape(B * NUM_SAMPLES, 1)
    vis = vis_sel.reshape(B * NUM_SAMPLES, 1)

    # ---- Pallas kernels: classifier (bf16 MXU + BN + ReLU) + masked CE ----
    loss = landmark_consistency_loss(feats, w1, gamma, beta, w2, b2, labels, vis)
    jax.block_until_ready(loss)

    ref = reference_loss(feats, w1, b1, gamma, beta, w2, b2, labels, vis)
    assert jnp.isfinite(loss), "loss is not finite"
    # bf16 MXU operands in the kernel vs. an all-f32 reference -> looser tolerance
    assert jnp.abs(loss - ref) < 2e-2 * (1.0 + jnp.abs(ref)), (loss, ref)

    print("KERNEL_OK")
</pallas_src>

<mosaic_0001>
module attributes {stable_mosaic.version = 11 : i64} {
  func.func @_bn_stats_kernel(%arg0: i32, %arg1: memref<64x64xf32, #tpu.memory_space<vmem>>, %arg2: memref<64x128xbf16, #tpu.memory_space<vmem>>, %arg3: memref<1x1x128xf32, #tpu.memory_space<vmem>>, %arg4: memref<1x1x128xf32, #tpu.memory_space<vmem>>) attributes {dimension_semantics = [#tpu.dimension_semantics<parallel>], iteration_bounds = array<i64: 1>, scalar_prefetch = 0 : i64, scratch_operands = 0 : i64, tpu.core_type = #tpu.core_type<tc>, window_params = [{transform_indices = @transform_0, window_bounds = array<i64: 64, 64>}, {pipeline_mode = #tpu.pipeline_mode<synchronous>, transform_indices = @transform_1, window_bounds = array<i64: 64, 128>}, {transform_indices = @transform_2, window_bounds = array<i64: 1, 1, 128>}, {transform_indices = @transform_3, window_bounds = array<i64: 1, 1, 128>}]} {
    %c0 = arith.constant 0 : index
    %c0_0 = arith.constant 0 : index
    %0 = vector.load %arg1[%c0, %c0_0] : memref<64x64xf32, #tpu.memory_space<vmem>>, vector<64x64xf32>
    %1 = arith.truncf %0 : vector<64x64xf32> to vector<64x64xbf16>
    %c0_1 = arith.constant 0 : index
    %c0_2 = arith.constant 0 : index
    %2 = vector.load %arg2[%c0_1, %c0_2] : memref<64x128xbf16, #tpu.memory_space<vmem>>, vector<64x128xbf16>
    %cst = arith.constant dense<0.000000e+00> : vector<64x128xf32>
    %3 = tpu.matmul %1, %2, %cst {dimension_numbers = #tpu.dot_dimension_numbers<[1], [0], [0], [1], [0, 0, 1, 1], [], []>} : vector<64x64xbf16>, vector<64x128xbf16>, vector<64x128xf32> -> vector<64x128xf32>
    %cst_3 = arith.constant dense<0.000000e+00> : vector<128xf32>
    %4 = vector.multi_reduction <add>, %3, %cst_3 [0] : vector<64x128xf32> to vector<128xf32>
    %5 = vector.shape_cast %4 : vector<128xf32> to vector<1x128xf32>
    %6 = vector.shape_cast %5 : vector<1x128xf32> to vector<1x1x128xf32>
    %c0_4 = arith.constant 0 : index
    %c0_5 = arith.constant 0 : index
    %c0_6 = arith.constant 0 : index
    %7 = vector.load %arg3[%c0_4, %c0_5, %c0_6] : memref<1x1x128xf32, #tpu.memory_space<vmem>>, vector<1x1x128xf32>
    tpu.vector_store %arg3[%c0_4, %c0_5, %c0_6], %6 {strides = array<i32>} : memref<1x1x128xf32, #tpu.memory_space<vmem>>, vector<1x1x128xf32>,
    %8 = arith.mulf %3, %3 : vector<64x128xf32>
    %cst_7 = arith.constant dense<0.000000e+00> : vector<128xf32>
    %9 = vector.multi_reduction <add>, %8, %cst_7 [0] : vector<64x128xf32> to vector<128xf32>
    %10 = vector.shape_cast %9 : vector<128xf32> to vector<1x128xf32>
    %11 = vector.shape_cast %10 : vector<1x128xf32> to vector<1x1x128xf32>
    %c0_8 = arith.constant 0 : index
    %c0_9 = arith.constant 0 : index
    %c0_10 = arith.constant 0 : index
    %12 = vector.load %arg4[%c0_8, %c0_9, %c0_10] : memref<1x1x128xf32, #tpu.memory_space<vmem>>, vector<1x1x128xf32>
    tpu.vector_store %arg4[%c0_8, %c0_9, %c0_10], %11 {strides = array<i32>} : memref<1x1x128xf32, #tpu.memory_space<vmem>>, vector<1x1x128xf32>,
    return
  }
  func.func @transform_0(%arg0: i32) -> (i32, i32) {
    %c0_i32 = arith.constant 0 : i32
    %c0_i32_0 = arith.constant 0 : i32
    return %arg0, %c0_i32 : i32, i32
  }
  func.func @transform_1(%arg0: i32) -> (i32, i32) {
    %c0_i32 = arith.constant 0 : i32
    %c0_i32_0 = arith.constant 0 : i32
    %c0_i32_1 = arith.constant 0 : i32
    return %c0_i32, %c0_i32_0 : i32, i32
  }
  func.func @transform_2(%arg0: i32) -> (i32, i32, i32) {
    %c0_i32 = arith.constant 0 : i32
    %c0_i32_0 = arith.constant 0 : i32
    %c0_i32_1 = arith.constant 0 : i32
    return %arg0, %c0_i32, %c0_i32_0 : i32, i32, i32
  }
  func.func @transform_3(%arg0: i32) -> (i32, i32, i32) {
    %c0_i32 = arith.constant 0 : i32
    %c0_i32_0 = arith.constant 0 : i32
    %c0_i32_1 = arith.constant 0 : i32
    return %arg0, %c0_i32, %c0_i32_0 : i32, i32, i32
  }
}

</mosaic_0001>

<bundles_post_ra>
// kernel: tpu_custom_call.1
= control target key start
LH: loop header
LB: loop body
LE: loop exit
PB: predicated region body
PF: predicated region fallthrough
CT: control target
= control target key end

     0   :  { %9 = vsyncpa [#allocation3], 0  ;;  %s468_s0 = inlined_call_operand.hbm [shape: f32[64,64], index: 0, kind: input, shape index: {}]   ;;  %s469_s1 = inlined_call_operand.hbm [shape: bf16[64,128], index: 1, kind: input, shape index: {}]   ;;  %s470_s2 = inlined_call_operand.hbm [shape: f32[1,1,128], index: 2, kind: output, shape index: {0}]   ;;  %s471_s3 = inlined_call_operand.hbm [shape: f32[1,1,128], index: 3, kind: output, shape index: {1}]  }
   0x1   :  { %10 = vsyncpa [#allocation6], 0 }
   0x2   :  { %11 = vsyncpa [#allocation4], 0 }
   0x3   :  { %12 = vsyncpa [#allocation9], 0  ;;  %s380_s12 = smov [#allocation2]   ;;  %s284_s16 = scalar_lea.hbm %s468_s0, 1024 }
   0x4   :  { %s18_s13 = sshll.u32 %s380_s12, 4  ;;  %p285_p0 = scmp.ne.s32.totalorder %s468_s0, %s284_s16  ;;  %s19_s13 = int_to_ptr.vmem [resolvable:$true] %s18_s13 }
   0x5   :  { %p288_p1 = scmp.lt.u32.totalorder %s284_s16, %s468_s0 }
   0x7   :  { %p290_p2 = pnand %p288_p1, %p285_p0 }
   0x9   :  { %293 = shalt.err (!%p290_p2)
}
   0xa   :  { %s294_s21 = scalar_lea.vmem %s19_s13, 1024  ;;  %p299_p4 = scmp.lt.s32.totalorder %s19_s13, %s19_s13 }
   0xb   :  { %p295_p3 = scmp.ne.s32.totalorder %s19_s13, %s294_s21  ;;  %p300_p5 = scmp.lt.s32.totalorder %s294_s21, %s294_s21 }
   0xd   :  { %p301_p6 = por %p300_p5, %p299_p4 }
   0xf   :  { %p302_p7 = pnand %p301_p6, %p295_p3 }
  0x11   :  { %305 = shalt.err (!%p302_p7)
}
  0x12   :  { %s381_s22 = smov 128   ;;  %s382_s23 = smov 8  }
  0x13   :  { %24 = dma.hbm_to_vmem [thread:$0]  %s468_s0, 1024, %s19_s13, [#allocation3], %s381_s22, %s381_s22, %s382_s23  }
  0x14   :  { %s383_s26 = smov [#allocation5]   ;;  %s306_s30 = scalar_lea.hbm %s469_s1, 512 }
  0x15   :  { %s30_s27 = sshll.u32 %s383_s26, 4  ;;  %p307_p8 = scmp.ne.s32.totalorder %s469_s1, %s306_s30  ;;  %s31_s27 = int_to_ptr.vmem [resolvable:$true] %s30_s27 }
  0x16   :  { %p310_p9 = scmp.lt.u32.totalorder %s306_s30, %s469_s1 }
  0x18   :  { %p312_p10 = pnand %p310_p9, %p307_p8 }
  0x1a   :  { %315 = shalt.err (!%p312_p10)
}
  0x1b   :  { %s316_s8 = scalar_lea.vmem %s31_s27, 512  ;;  %p321_p12 = scmp.lt.s32.totalorder %s31_s27, %s31_s27 }
  0x1c   :  { %p317_p11 = scmp.ne.s32.totalorder %s31_s27, %s316_s8  ;;  %p322_p13 = scmp.lt.s32.totalorder %s316_s8, %s316_s8 }
  0x1e   :  { %p323_p0 = por %p322_p13, %p321_p12 }
  0x20   :  { %p324_p1 = pnand %p323_p0, %p317_p11 }
  0x22   :  { %327 = shalt.err (!%p324_p1)
}
  0x23   :  { %s384_s0 = smov 64   ;;  %s385_s9 = smov 4  }
  0x24   :  { %36 = dma.hbm_to_vmem [thread:$0]  %s469_s1, 512, %s31_s27, [#allocation6], %s384_s0, %s384_s0, %s385_s9  }
  0x25   :  { %372 = dma.done.wait [#allocation3], 1024  }
  0x26   :  { %373 = vsyncadd [#allocation3], 4294966272 }
  0x27   :  { %374 = dma.done.wait [#allocation6], 512  }
  0x28   :  { %375 = vsyncadd [#allocation6], 4294966784  ;;  %v280_v0 = vld [vmem:[#allocation5] sm:$0xff]   ;;  %v281_v1 = vld [vmem:[#allocation5 + $0x8] sm:$0xff]   ;;  %vm88_vm0 = vcmask 523264   ;;  %s386_s1 = smov [#allocation7]  }
  0x29   :  { %248 = vmatprep.subr.bf16.mxu0 %v280_v0  ;;  %264 = vmatprep.subr.bf16.mxu1 %v280_v0  ;;  %v282_v2 = vld [vmem:[#allocation5 + $0x10] sm:$0xff]   ;;  %v44_v3 = vld [vmem:[#allocation2] sm:$0xff]  ;;  %v45_v4 = vld [vmem:[#allocation2 + $0x8] sm:$0xff]  ;;  %s208_s12 = sshll.u32 %s386_s1, 4  ;;  %s387_s13 = smov [#allocation8]   ;;  %s209_s12 = int_to_ptr.vmem [resolvable:$true] %s208_s12 }
  0x2a   :  { %249 = vmatpush3.bf16.msra.mxu0 %v280_v0  ;;  %268 = vmatpush3.bf16.msra.mxu1 %v280_v0  ;;  %v52_v5 = vpack.c.bf16 %v45_v4, %v44_v3  ;;  %v48_v6 = vld [vmem:[#allocation2 + $0x20] sm:$0xff]  ;;  %v49_v7 = vld [vmem:[#allocation2 + $0x28] sm:$0xff]  ;;  %v283_v9 = vld [vmem:[#allocation5 + $0x18] sm:$0xff]   ;;  %s218_s14 = sshll.u32 %s387_s13, 4  ;;  %s328_s15 = scalar_lea.vmem %s209_s12, 16  ;;  %s436_s14 = int_to_ptr.vmem [resolvable:$true] %s218_s14 }
  0x2b   :  { %250 = vmatprep.subr.bf16.mxu0 %v281_v1  ;;  %265 = vmatprep.subr.bf16.mxu1 %v281_v1  ;;  %v54_v8 = vpack.c.bf16 %v49_v7, %v48_v6  ;;  %v46_v10 = vld [vmem:[#allocation2 + $0x10] sm:$0xff]  ;;  %v47_v11 = vld [vmem:[#allocation2 + $0x18] sm:$0xff]  ;;  %p329_p2 = scmp.ne.s32.totalorder %s209_s12, %s328_s15  ;;  %s332_s16 = scalar_lea.vmem %s209_s12, 32 }
  0x2c   :  { %256 = vmatprep.mubr.msk.bf16.mxu0 %vm88_vm0, %v52_v5  ;;  %v50_v12 = vld [vmem:[#allocation2 + $0x30] sm:$0xff]  ;;  %v51_v13 = vld [vmem:[#allocation2 + $0x38] sm:$0xff]  ;;  %v53_v14 = vpack.c.bf16 %v47_v11, %v46_v10  ;;  %p333_p3 = scmp.lt.s32.totalorder %s209_s12, %s209_s12  ;;  %p334_p4 = scmp.lt.s32.totalorder %s332_s16, %s328_s15 }
  0x2d   :  { %260 = vmatprep.mubr.msk.bf16.mxu1 %vm88_vm0, %v54_v8  ;;  %v55_v15 = vpack.c.bf16 %v51_v13, %v50_v12 }
  0x2e   :  { %251 = vmatpush3.bf16.msra.mxu0 %v281_v1  ;;  %269 = vmatpush3.bf16.msra.mxu1 %v281_v1  ;;  %p335_p5 = por %p334_p4, %p333_p3 }
  0x2f   :  { %252 = vmatprep.subr.bf16.mxu0 %v282_v2  ;;  %266 = vmatprep.subr.bf16.mxu1 %v282_v2 }
  0x30   :  { %p336_p6 = pnand %p335_p5, %p329_p2 }
  0x32   :  { %253 = vmatpush3.bf16.msra.mxu0 %v282_v2  ;;  %270 = vmatpush3.bf16.msra.mxu1 %v282_v2 }
  0x33   :  { %254 = vmatprep.subr.bf16.mxu0 %v283_v9  ;;  %267 = vmatprep.subr.bf16.mxu1 %v283_v9 }
  0x36   :  { %255 = vmatpush3.bf16.msra.mxu0 %v283_v9  ;;  %271 = vmatpush3.bf16.msra.mxu1 %v283_v9 }
  0x39   :  { %257 = vmatmul.mubr.msk.bf16.vlgmr.msra.gmra.mrb[0].mxu0 %vm88_vm0, %v53_v14  ;;  %261 = vmatmul.mubr.msk.bf16.vlgmr.msra.gmra.mrb[0].mxu1 %vm88_vm0, %v55_v15 }
 0x10c   :  { %v258_v16 = vpop.f32.mrb[0].mxu0  ;;  %v262_v17 = vpop.f32.mrb[0].mxu1 }
 0x10d   :  { %v135_v18 = vpop.f32.mrb[1].mxu0  ;;  %v151_v19 = vpop.f32.mrb[1].mxu1  ;;  %v182_v27 = vmul.f32 %v258_v16, %v258_v16  ;;  %v186_v39 = vmul.f32 %v262_v17, %v262_v17 }
 0x10e   :  { %v259_v20 = vpop.f32.mrb[2].mxu0  ;;  %v263_v21 = vpop.f32.mrb[2].mxu1  ;;  %v180_v24 = vmul.f32 %v135_v18, %v135_v18  ;;  %v184_v33 = vmul.f32 %v151_v19, %v151_v19 }
 0x10f   :  { %v138_v22 = vpop.f32.mrb[3].mxu0  ;;  %v154_v23 = vpop.f32.mrb[3].mxu1  ;;  %v183_v30 = vmul.f32 %v259_v20, %v259_v20  ;;  %v187_v42 = vmul.f32 %v263_v21, %v263_v21 }
 0x110   :  { %v166_v25 = vadd.f32 %v138_v22, %v135_v18  ;;  %v181_v26 = vmul.f32 %v138_v22, %v138_v22  ;;  %v185_v38 = vmul.f32 %v154_v23, %v154_v23 }
 0x112   :  { %v167_v28 = vadd.f32 %v258_v16, %v166_v25  ;;  %v188_v29 = vadd.f32 %v181_v26, %v180_v24 }
 0x114   :  { %v189_v31 = vadd.f32 %v188_v29, %v182_v27  ;;  %v168_v32 = vadd.f32 %v259_v20, %v167_v28 }
 0x116   :  { %v169_v34 = vadd.f32 %v168_v32, %v151_v19  ;;  %v190_v35 = vadd.f32 %v189_v31, %v183_v30 }
 0x118   :  { %v191_v36 = vadd.f32 %v190_v35, %v184_v33  ;;  %v170_v37 = vadd.f32 %v169_v34, %v154_v23 }
 0x11a   :  { %v171_v40 = vadd.f32 %v262_v17, %v170_v37  ;;  %v192_v41 = vadd.f32 %v191_v36, %v185_v38 }
 0x11c   :  { %v172_v43 = vadd.f32 %v263_v21, %v171_v40  ;;  %v193_v44 = vadd.f32 %v192_v41, %v186_v39 }
 0x11e   :  { %v173_v45 = vrot.slane %v172_v43, 4  ;;  %v194_v46 = vadd.f32 %v193_v44, %v187_v42 }
 0x120   :  { %v174_v47 = vadd.f32 %v173_v45, %v172_v43  ;;  %v195_v48 = vrot.slane %v194_v46, 4 }
 0x122   :  { %v175_v49 = vrot.slane %v174_v47, 2  ;;  %v196_v50 = vadd.f32 %v195_v48, %v194_v46 }
 0x124   :  { %v176_v51 = vadd.f32 %v175_v49, %v174_v47  ;;  %v197_v52 = vrot.slane %v196_v50, 2 }
 0x126   :  { %v177_v53 = vrot.slane %v176_v51, 1  ;;  %v198_v54 = vadd.f32 %v197_v52, %v196_v50 }
 0x128   :  { %v178_v55 = vadd.f32 %v177_v53, %v176_v51  ;;  %v199_v56 = vrot.slane %v198_v54, 1 }
 0x12a   :  { %179 = vst [vmem:[#allocation7] sm:$0x1] %v178_v55  ;;  %v200_v57 = vadd.f32 %v199_v56, %v198_v54 }
 0x12b   :  { %339 = shalt.err (!%p336_p6)
}
 0x12c   :  { %s340_s19 = scalar_lea.hbm %s470_s2, 16 }
 0x12d   :  { %p341_p7 = scmp.ne.s32.totalorder %s470_s2, %s340_s19  ;;  %p344_p8 = scmp.lt.u32.totalorder %s340_s19, %s470_s2 }
 0x12f   :  { %p346_p9 = pnand %p344_p8, %p341_p7 }
 0x131   :  { %349 = shalt.err (!%p346_p9)
}
 0x132   :  { %211 = dma.vmem_to_hbm [thread:$0]  %s209_s12, 16, %s470_s2, [#allocation4]   ;;  %201 = vst [vmem:[#allocation8] sm:$0x1] %v200_v57 }
 0x133   :  { %s350_s26 = scalar_lea.vmem %s436_s14, 16  ;;  %s354_s27 = scalar_lea.vmem %s436_s14, 32 }
 0x134   :  { %p351_p10 = scmp.ne.s32.totalorder %s436_s14, %s350_s26  ;;  %p355_p11 = scmp.lt.s32.totalorder %s436_s14, %s436_s14 }
 0x135   :  { %p356_p12 = scmp.lt.s32.totalorder %s354_s27, %s350_s26 }
 0x137   :  { %p357_p13 = por %p356_p12, %p355_p11 }
 0x139   :  { %p358_p0 = pnand %p357_p13, %p351_p10 }
 0x13b   :  { %361 = shalt.err (!%p358_p0)
}
 0x13c   :  { %s362_s30 = scalar_lea.hbm %s471_s3, 16 }
 0x13d   :  { %p363_p1 = scmp.ne.s32.totalorder %s471_s3, %s362_s30  ;;  %p366_p2 = scmp.lt.u32.totalorder %s362_s30, %s471_s3 }
 0x13f   :  { %p368_p3 = pnand %p366_p2, %p363_p1 }
 0x141   :  { %371 = shalt.err (!%p368_p3)
}
 0x142   :  { %221 = dma.vmem_to_hbm [thread:$0]  %s436_s14, 16, %s471_s3, [#allocation9]  }
 0x143   :  { %376 = dma.done.wait [#allocation4], 16  }
 0x144   :  { %377 = vsyncadd [#allocation4], 4294967280 }
 0x145   :  { %378 = dma.done.wait [#allocation9], 16  }
 0x146   :  { %379 = vsyncadd [#allocation9], 4294967280 }
 0x147   :  { %228 = vsyncpa [#allocation3], 1 }
 0x148   :  { %229 = vsyncpa [#allocation6], 1 }
 0x149   :  { %230 = vsyncpa [#allocation4], 1 }
 0x14a   :  { %231 = vsyncpa [#allocation9], 1 }

</bundles_post_ra>
